<compile_context>
chip_gen: v5e
topology: v5e:2x2
jax: 0.10.0
libtpu: 0.0.40
codegen_flags: <defaults>
</compile_context>

<pallas_src>
import functools

import jax
import jax.numpy as jnp
from jax.experimental import pallas as pl
from jax.experimental.pallas import tpu as pltpu


def _round_up(n, m):
    return ((n + m - 1) // m) * m


def post_block_kernel(x_ref, w_ref, o_ref):
    # x_ref: (TM, E)   w_ref: (TN, E)   o_ref: (TM, TN)
    xl = x_ref[...].astype(jnp.float32)
    # L2-normalize along E, matching F.normalize(eps=1e-12):
    #   x / max(||x||, 1e-12) == x * rsqrt(max(||x||^2, 1e-24))
    sq = jnp.sum(xl * xl, axis=-1, keepdims=True)            # (TM, 1), f32
    xn = xl * jax.lax.rsqrt(jnp.maximum(sq, 1e-24))           # EUP rsqrt, VPU mul
    # MXU matmul contracting the E axis of both operands (== x @ w.T) with
    # native-dtype operands and f32 accumulation; no weight transpose anywhere.
    o_ref[...] = jax.lax.dot_general(
        xn.astype(w_ref.dtype),
        w_ref[...],
        dimension_numbers=(((1,), (1,)), ((), ())),
        preferred_element_type=jnp.float32,
    ).astype(o_ref.dtype)


@functools.partial(jax.jit, static_argnames=("tn",))
def post_block(x, w, *, tn=256):
    """x: (B, S, E), w: (C, E) (PyTorch nn.Linear weight layout). Returns (B, C)."""
    B, S, E = x.shape
    C, _ = w.shape
    out_dtype = x.dtype

    # --- select the last token in the wrapper: only (B, E) reaches the kernel
    xl = x[:, -1, :]                                          # (B, E)

    # --- tile sizes: TM multiple of 8 (sublanes), TN multiple of 128 (lanes)
    TM = min(256, _round_up(B, 8))
    Bp = _round_up(B, TM)
    Cp = _round_up(C, 128)
    TN = tn if (tn % 128 == 0 and Cp % tn == 0) else 128      # Cp is a 128-multiple

    if Bp != B:
        xl = jnp.pad(xl, ((0, Bp - B), (0, 0)))
    wp = w if Cp == C else jnp.pad(w, ((0, Cp - C), (0, 0)))

    cost = pl.CostEstimate(
        flops=2 * B * E * C,
        transcendentals=B * (Cp // TN),
        bytes_accessed=(B * E + C * E) * x.dtype.itemsize + B * C * out_dtype.itemsize,
    )

    out = pl.pallas_call(
        post_block_kernel,
        out_shape=jax.ShapeDtypeStruct((Bp, Cp), out_dtype),
        grid_spec=pltpu.PrefetchScalarGridSpec(
            num_scalar_prefetch=0,
            grid=(Bp // TM, Cp // TN),
            in_specs=[
                # activations: constant across the class axis -> stays VMEM-resident
                pl.BlockSpec((TM, E), lambda i, j: (i, 0)),
                # weight: streamed / double-buffered along the class dimension
                pl.BlockSpec((TN, E), lambda i, j: (j, 0)),
            ],
            out_specs=pl.BlockSpec((TM, TN), lambda i, j: (i, j)),
        ),
        compiler_params=pltpu.CompilerParams(
            # all output tiles independent -> shardable across v7x's 2 TensorCores
            dimension_semantics=("parallel", "parallel"),
        ),
        cost_estimate=cost,
    )(xl, wp)

    return out[:B, :C]


def post_block_ref(x, w):
    """Pure-JAX reference of the PyTorch forward."""
    xl = x[:, -1].astype(jnp.float32)
    norm = jnp.sqrt(jnp.sum(xl * xl, axis=-1, keepdims=True))
    xn = xl / jnp.maximum(norm, 1e-12)
    return xn @ w.T.astype(jnp.float32)


if __name__ == "__main__":
    # small shapes consistent with the module: batch=2, seq=8, emb_size=32, num_class=16
    B, S, E, C = 2, 8, 32, 16

    key = jax.random.PRNGKey(0)
    kx, kw = jax.random.split(key)
    x = jax.random.normal(kx, (B, S, E), dtype=jnp.float32)
    # deterministic init matching nn.init.normal_(mean=0, std=0.02)
    w = 0.02 * jax.random.normal(kw, (C, E), dtype=jnp.float32)

    out = post_block(x, w)
    out = jax.block_until_ready(out)

    ref = post_block_ref(x, w)
    assert out.shape == (B, C)
    assert jnp.allclose(out.astype(jnp.float32), ref, atol=1e-5, rtol=1e-5), "mismatch vs reference"

    print("KERNEL_OK")
</pallas_src>

<mosaic_0001>
module attributes {stable_mosaic.version = 11 : i64} {
  func.func @post_block_kernel(%arg0: i32, %arg1: i32, %arg2: memref<8x32xf32, #tpu.memory_space<vmem>>, %arg3: memref<128x32xf32, #tpu.memory_space<vmem>>, %arg4: memref<8x128xf32, #tpu.memory_space<vmem>>) attributes {dimension_semantics = [#tpu.dimension_semantics<parallel>, #tpu.dimension_semantics<parallel>], iteration_bounds = array<i64: 1, 1>, scalar_prefetch = 0 : i64, scratch_operands = 0 : i64, tpu.core_type = #tpu.core_type<tc>, window_params = [{transform_indices = @transform_0, window_bounds = array<i64: 8, 32>}, {transform_indices = @transform_1, window_bounds = array<i64: 128, 32>}, {transform_indices = @transform_2, window_bounds = array<i64: 8, 128>}]} {
    %c0 = arith.constant 0 : index
    %c0_0 = arith.constant 0 : index
    %0 = vector.load %arg2[%c0, %c0_0] : memref<8x32xf32, #tpu.memory_space<vmem>>, vector<8x32xf32>
    %1 = arith.mulf %0, %0 : vector<8x32xf32>
    %cst = arith.constant dense<0.000000e+00> : vector<8xf32>
    %2 = vector.multi_reduction <add>, %1, %cst [1] : vector<8x32xf32> to vector<8xf32>
    %3 = vector.shape_cast %2 : vector<8xf32> to vector<8x1xf32>
    %cst_1 = arith.constant 1.000000e-24 : f32
    %4 = vector.broadcast %cst_1 : f32 to vector<8x1xf32>
    %5 = arith.maximumf %3, %4 : vector<8x1xf32>
    %6 = math.rsqrt %5 : vector<8x1xf32>
    %7 = vector.broadcast %6 : vector<8x1xf32> to vector<8x32xf32>
    %8 = arith.mulf %0, %7 : vector<8x32xf32>
    %c0_2 = arith.constant 0 : index
    %c0_3 = arith.constant 0 : index
    %9 = vector.load %arg3[%c0_2, %c0_3] : memref<128x32xf32, #tpu.memory_space<vmem>>, vector<128x32xf32>
    %cst_4 = arith.constant dense<0.000000e+00> : vector<8x128xf32>
    %10 = tpu.matmul %8, %9, %cst_4 {dimension_numbers = #tpu.dot_dimension_numbers<[1], [1], [0], [0], [0, 0, 1, 0], [], []>} : vector<8x32xf32>, vector<128x32xf32>, vector<8x128xf32> -> vector<8x128xf32>
    %c0_5 = arith.constant 0 : index
    %c0_6 = arith.constant 0 : index
    %11 = vector.load %arg4[%c0_5, %c0_6] : memref<8x128xf32, #tpu.memory_space<vmem>>, vector<8x128xf32>
    tpu.vector_store %arg4[%c0_5, %c0_6], %10 {strides = array<i32>} : memref<8x128xf32, #tpu.memory_space<vmem>>, vector<8x128xf32>,
    return
  }
  func.func @transform_0(%arg0: i32, %arg1: i32) -> (i32, i32) {
    %c0_i32 = arith.constant 0 : i32
    %c0_i32_0 = arith.constant 0 : i32
    return %arg0, %c0_i32 : i32, i32
  }
  func.func @transform_1(%arg0: i32, %arg1: i32) -> (i32, i32) {
    %c0_i32 = arith.constant 0 : i32
    %c0_i32_0 = arith.constant 0 : i32
    return %arg1, %c0_i32 : i32, i32
  }
  func.func @transform_2(%arg0: i32, %arg1: i32) -> (i32, i32) {
    %c0_i32 = arith.constant 0 : i32
    return %arg0, %arg1 : i32, i32
  }
}

</mosaic_0001>

<bundles_post_ra>
// kernel: post_block.1
= control target key start
LH: loop header
LB: loop body
LE: loop exit
PB: predicated region body
PF: predicated region fallthrough
CT: control target
= control target key end

     0   :  { %vm13_vm0 = vcmask 261120   ;;  %s227_s0 = inlined_call_operand.vmem [shape: f32[8,32], index: 0, kind: input, shape index: {}]   ;;  %s228_s1 = inlined_call_operand.vmem [shape: f32[128,32], index: 1, kind: input, shape index: {}]   ;;  %s229_s2 = inlined_call_operand.vmem [shape: f32[8,128], index: 2, kind: output, shape index: {}]  }
   0x1   :  { %v11_v0 = vld [vmem:[%s227_s0] sm:$0xff]  ;;  %v44_v1 = vld [vmem:[%s228_s1 + $0x78] sm:$0xff]  ;;  %v43_v3 = vld [vmem:[%s228_s1 + $0x70] sm:$0xff] }
   0x2   :  { %v12_v2 = vmul.f32 %v11_v0, %v11_v0  ;;  %121 = vmatpush.xpose.msk.msra.mxu0 %vm13_vm0, %v44_v1  ;;  %v42_v5 = vld [vmem:[%s228_s1 + $0x68] sm:$0xff]  ;;  %v41_v6 = vld [vmem:[%s228_s1 + $0x60] sm:$0xff]  ;;  %v40_v7 = vld [vmem:[%s228_s1 + $0x58] sm:$0xff] }
   0x3   :  { %v39_v8 = vld [vmem:[%s228_s1 + $0x50] sm:$0xff]  ;;  %v38_v9 = vld [vmem:[%s228_s1 + $0x48] sm:$0xff]  ;;  %v37_v10 = vld [vmem:[%s228_s1 + $0x40] sm:$0xff] }
   0x4   :  { %v14_v4 = vsel %vm13_vm0, %v12_v2, 0.0  ;;  %v36_v11 = vld [vmem:[%s228_s1 + $0x38] sm:$0xff]  ;;  %v35_v12 = vld [vmem:[%s228_s1 + $0x30] sm:$0xff]  ;;  %v34_v13 = vld [vmem:[%s228_s1 + $0x28] sm:$0xff] }
   0x5   :  { %15 = vadd.xlane.f32.xlu0 %v14_v4  ;;  %v33_v14 = vld [vmem:[%s228_s1 + $0x20] sm:$0xff]  ;;  %v32_v15 = vld [vmem:[%s228_s1 + $0x18] sm:$0xff]  ;;  %v31_v16 = vld [vmem:[%s228_s1 + $0x10] sm:$0xff] }
   0x6   :  { %122 = vmatpush.xpose.msk.msra.mxu0 %vm13_vm0, %v43_v3  ;;  %v30_v17 = vld [vmem:[%s228_s1 + $0x8] sm:$0xff]  ;;  %v29_v18 = vld [vmem:[%s228_s1] sm:$0xff] }
   0xa   :  { %123 = vmatpush.xpose.msk.msra.mxu0 %vm13_vm0, %v42_v5 }
   0xe   :  { %124 = vmatpush.xpose.msk.msra.mxu0 %vm13_vm0, %v41_v6 }
  0x12   :  { %125 = vmatpush.xpose.msk.msra.mxu0 %vm13_vm0, %v40_v7 }
  0x16   :  { %126 = vmatpush.xpose.msk.msra.mxu0 %vm13_vm0, %v39_v8 }
  0x1a   :  { %127 = vmatpush.xpose.msk.msra.mxu0 %vm13_vm0, %v38_v9 }
  0x1e   :  { %128 = vmatpush.xpose.msk.msra.mxu0 %vm13_vm0, %v37_v10 }
  0x22   :  { %129 = vmatpush.xpose.msk.msra.mxu0 %vm13_vm0, %v36_v11 }
  0x26   :  { %130 = vmatpush.xpose.msk.msra.mxu0 %vm13_vm0, %v35_v12 }
  0x2a   :  { %131 = vmatpush.xpose.msk.msra.mxu0 %vm13_vm0, %v34_v13 }
  0x2e   :  { %132 = vmatpush.xpose.msk.msra.mxu0 %vm13_vm0, %v33_v14 }
  0x32   :  { %133 = vmatpush.xpose.msk.msra.mxu0 %vm13_vm0, %v32_v15 }
  0x36   :  { %134 = vmatpush.xpose.msk.msra.mxu0 %vm13_vm0, %v31_v16 }
  0x3a   :  { %135 = vmatpush.xpose.msk.msra.mxu0 %vm13_vm0, %v30_v17 }
  0x3e   :  { %136 = vmatpush.xpose.msk.msra.mxu0 %vm13_vm0, %v29_v18 }
  0x78   :  { %v16_v19 = vpop.xlane.xlu0 %15 }
  0x79   :  { %v17_v20 = vmax.f32 %v16_v19, 1e-24 }
  0x7b   :  { %138 = vrsqrt.f32 %v17_v20  ;;  %vm24_vm2 = vweird.f32 %v17_v20 }
  0x81   :  { %v139_v21 = vpop.eup %138 }
  0x82   :  { %v19_v22 = vmul.f32 %v139_v21, %v17_v20  ;;  %vm25_vm1 = vweird.f32 %v139_v21 }
  0x83   :  { %vm26_vm3 = vmor %vm24_vm2, %vm25_vm1 }
  0x84   :  { %v20_v23 = vmul.f32 %v139_v21, %v19_v22 }
  0x86   :  { %v21_v24 = vmul.f32 0.5, %v20_v23 }
  0x88   :  { %v22_v25 = vsub.f32 1.5, %v21_v24 }
  0x8a   :  { %v23_v26 = vmul.f32 %v139_v21, %v22_v25 }
  0x8c   :  { %v27_v27 = vsel %vm26_vm3, %v139_v21, %v23_v26 }
  0x8d   :  { %v28_v28 = vmul.f32 %v27_v27, %v11_v0 }
  0x8f   :  { %137 = vmatmul.msk.f32.vlgmr.msra.gmra.mxu0 %vm13_vm0, %v28_v28 }
 0x10c   :  { %v113_v29 = vpop.f32.mrf.mxu0 }
 0x10d   :  { %116 = vst [vmem:[%s229_s2] sm:$0xff] %v113_v29 }

</bundles_post_ra>
